<compile_context>
chip_gen: v7x
topology: tpu7x:2x2x1
jax: 0.10.0
libtpu: 0.0.40
codegen_flags: <defaults>
</compile_context>

<pallas_src>
import functools

import jax
import jax.numpy as jnp
from jax.experimental import pallas as pl
from jax.experimental.pallas import tpu as pltpu

LRELU_ALPHA = 0.2
KW = 4          # conv kernel size
PADW = 2        # int(ceil((4-1)/2)) == 2

VMEM_LIMIT = 32 * 1024 * 1024   # explicit, portable across v5e/v6e/v7x scoped defaults


def _round_up(x, m):
    return ((x + m - 1) // m) * m


# ----------------------------------------------------------------------------
# Pallas kernels
# ----------------------------------------------------------------------------
def _matmul_bias_act_kernel(x_ref, w_ref, b_ref, o_ref, acc_ref, *, alpha):
    """Tiled (im2col patches) @ (weights) with K-axis accumulation.

    bf16 operands -> MXU -> f32 VMEM accumulator; bias + LeakyReLU epilogue in f32.
    """
    k = pl.program_id(2)

    @pl.when(k == 0)
    def _():
        acc_ref[...] = jnp.zeros_like(acc_ref)

    acc_ref[...] += jnp.dot(x_ref[...], w_ref[...],
                            preferred_element_type=jnp.float32)

    @pl.when(k == pl.num_programs(2) - 1)
    def _():
        acc = acc_ref[...] + b_ref[...]            # b_ref: (1, tn) broadcast over tm
        if alpha is not None:
            acc = jnp.where(acc >= 0.0, acc, alpha * acc)
        o_ref[...] = acc.astype(o_ref.dtype)


def _avgpool_kernel(p_ref, r_ref, o_ref, acc_ref):
    """Sum the 9 shifted window taps (reduction grid axis) and scale by 1/valid-count."""
    t = pl.program_id(1)

    @pl.when(t == 0)
    def _():
        acc_ref[...] = jnp.zeros_like(acc_ref)

    acc_ref[...] += p_ref[0].astype(jnp.float32)   # p_ref: (1, tm, C)

    @pl.when(t == pl.num_programs(1) - 1)
    def _():
        o_ref[...] = (acc_ref[...] * r_ref[...]).astype(o_ref.dtype)


# ----------------------------------------------------------------------------
# Conv2d (kernel=4, padding=2) + optional LeakyReLU via im2col + tiled Pallas matmul
# ----------------------------------------------------------------------------
def conv2d_act(x, w, b, stride, alpha):
    """x: (N,H,W,Cin) f32; w: (kh,kw,Cin,Cout) f32; b: (Cout,) f32."""
    N, H, W, Cin = x.shape
    kh, kw, _, Cout = w.shape
    pad = PADW
    Ho = (H + 2 * pad - kh) // stride + 1
    Wo = (W + 2 * pad - kw) // stride + 1

    # im2col (plain JAX glue); (dy,dx,cin) ordering matches w.reshape below.
    xp = jnp.pad(x, ((0, 0), (pad, pad), (pad, pad), (0, 0)))
    pats = []
    for dy in range(kh):
        for dx in range(kw):
            pats.append(xp[:, dy:dy + Ho * stride:stride,
                              dx:dx + Wo * stride:stride, :])
    pat = jnp.concatenate(pats, axis=-1)                    # (N,Ho,Wo,kh*kw*Cin)

    M = N * Ho * Wo
    K = kh * kw * Cin
    x2d = pat.reshape(M, K).astype(jnp.bfloat16)            # bf16 MXU operands
    w2d = w.reshape(K, Cout).astype(jnp.bfloat16)
    b2d = b.reshape(1, Cout).astype(jnp.float32)

    # Tile sizes: lane-dense (128-aligned) K/Cout, 8-aligned M; sized well under VMEM
    # even with v7x's 64 MiB (double-buffered tiles here are ~1-2 MiB total).
    tm = min(256, _round_up(M, 8))
    Cp = _round_up(Cout, 128)
    tn = min(512, Cp)
    tk = min(512, _round_up(K, 128))
    Mp = _round_up(M, tm)
    Np = _round_up(Cp, tn)
    Kp = _round_up(K, tk)

    x2d = jnp.pad(x2d, ((0, Mp - M), (0, Kp - K)))
    w2d = jnp.pad(w2d, ((0, Kp - K), (0, Np - Cout)))
    b2d = jnp.pad(b2d, ((0, 0), (0, Np - Cout)))

    grid = (Mp // tm, Np // tn, Kp // tk)                   # reduction (K) axis last

    out2d = pl.pallas_call(
        functools.partial(_matmul_bias_act_kernel, alpha=alpha),
        out_shape=jax.ShapeDtypeStruct((Mp, Np), jnp.float32),
        grid_spec=pltpu.PrefetchScalarGridSpec(
            num_scalar_prefetch=0,
            grid=grid,
            in_specs=[pl.BlockSpec((tm, tk), lambda i, j, k: (i, k)),
                      pl.BlockSpec((tk, tn), lambda i, j, k: (k, j)),
                      pl.BlockSpec((1, tn), lambda i, j, k: (0, j))],
            out_specs=pl.BlockSpec((tm, tn), lambda i, j, k: (i, j)),
            scratch_shapes=[pltpu.VMEM((tm, tn), jnp.float32)]),
        compiler_params=pltpu.CompilerParams(
            dimension_semantics=("parallel", "parallel", "arbitrary"),
            vmem_limit_bytes=VMEM_LIMIT),
        cost_estimate=pl.CostEstimate(
            flops=2 * Mp * Kp * Np,
            transcendentals=0,
            bytes_accessed=Mp * Kp * 2 + Kp * Np * 2 + Mp * Np * 4),
    )(x2d, w2d, b2d)

    return out2d[:M, :Cout].reshape(N, Ho, Wo, Cout)


# ----------------------------------------------------------------------------
# AvgPool2d(3, stride=2, padding=1, count_include_pad=False)
# ----------------------------------------------------------------------------
def avgpool3x3_s2(x):
    N, H, W, C = x.shape
    k, s, pad = 3, 2, 1
    Ho = (H + 2 * pad - k) // s + 1
    Wo = (W + 2 * pad - k) // s + 1

    xp = jnp.pad(x, ((0, 0), (pad, pad), (pad, pad), (0, 0)))
    mp = jnp.pad(jnp.ones((1, H, W, 1), x.dtype),
                 ((0, 0), (pad, pad), (pad, pad), (0, 0)))

    pats, cnts = [], []
    for dy in range(k):
        for dx in range(k):
            pats.append(xp[:, dy:dy + Ho * s:s, dx:dx + Wo * s:s, :])
            cnts.append(mp[:, dy:dy + Ho * s:s, dx:dx + Wo * s:s, :])

    M = N * Ho * Wo
    patches = jnp.stack(pats, axis=0).reshape(k * k, M, C)     # (9, M, C)
    counts = sum(cnts)                                         # (1,Ho,Wo,1), >= 1
    recip = jnp.broadcast_to(1.0 / counts, (N, Ho, Wo, 1)).reshape(M, 1)

    tm = min(512, _round_up(M, 8))
    Mp = _round_up(M, tm)
    patches = jnp.pad(patches, ((0, 0), (0, Mp - M), (0, 0)))
    recip = jnp.pad(recip, ((0, Mp - M), (0, 0)))

    grid = (Mp // tm, k * k)                                   # tap (reduction) axis last

    out = pl.pallas_call(
        _avgpool_kernel,
        out_shape=jax.ShapeDtypeStruct((Mp, C), jnp.float32),
        grid_spec=pltpu.PrefetchScalarGridSpec(
            num_scalar_prefetch=0,
            grid=grid,
            in_specs=[pl.BlockSpec((1, tm, C), lambda i, t: (t, i, 0)),
                      pl.BlockSpec((tm, 1), lambda i, t: (i, 0))],
            out_specs=pl.BlockSpec((tm, C), lambda i, t: (i, 0)),
            scratch_shapes=[pltpu.VMEM((tm, C), jnp.float32)]),
        compiler_params=pltpu.CompilerParams(
            dimension_semantics=("parallel", "arbitrary"),
            vmem_limit_bytes=VMEM_LIMIT),
        cost_estimate=pl.CostEstimate(
            flops=9 * Mp * C,
            transcendentals=0,
            bytes_accessed=9 * Mp * C * 4 + Mp * 4 + Mp * C * 4),
    )(patches, recip)

    return out[:M].reshape(N, Ho, Wo, C)


# ----------------------------------------------------------------------------
# Parameter construction (deterministic, synthetic)
# ----------------------------------------------------------------------------
def _spectral_normalize(w_torch_layout, n_iter=15):
    """w: (Cout, Cin, kh, kw). Divide by the spectral norm of its (Cout, -1) view."""
    cout = w_torch_layout.shape[0]
    wm = w_torch_layout.reshape(cout, -1)
    u = jnp.ones((cout,), wm.dtype) / jnp.sqrt(jnp.float32(cout))
    for _ in range(n_iter):
        v = wm.T @ u
        v = v / (jnp.linalg.norm(v) + 1e-12)
        u = wm @ v
        u = u / (jnp.linalg.norm(u) + 1e-12)
    sigma = u @ (wm @ v)
    return w_torch_layout / sigma


def init_nlayer_params(key, input_nc, ndf, n_layers):
    """Mirrors NLayerDiscriminator.__init__ (use_sigmoid=False, getIntermFeat=False)."""
    cfg = []                                  # (cin, cout, stride, spectral, lrelu)
    cfg.append((input_nc, ndf, 2, False, True))
    nf = ndf
    for _ in range(1, n_layers):
        nf_prev, nf = nf, min(nf * 2, 512)
        cfg.append((nf_prev, nf, 2, True, True))
    nf_prev, nf = nf, min(nf * 2, 512)
    cfg.append((nf_prev, nf, 1, True, True))
    cfg.append((nf, 1, 1, False, False))

    params = []
    for (cin, cout, stride, sn, lrelu) in cfg:
        key, k1, k2 = jax.random.split(key, 3)
        w = jax.random.normal(k1, (cout, cin, KW, KW), jnp.float32) * 0.05
        b = jax.random.normal(k2, (cout,), jnp.float32) * 0.01
        if sn:
            w = _spectral_normalize(w)        # folded weight reparameterization
        w = jnp.transpose(w, (2, 3, 1, 0))    # -> (kh, kw, Cin, Cout)
        params.append(dict(w=w, b=b, stride=stride, lrelu=lrelu))
    return params, key


# ----------------------------------------------------------------------------
# Forward passes
# ----------------------------------------------------------------------------
def nlayer_forward(params, x_nhwc):
    y = x_nhwc
    for p in params:
        y = conv2d_act(y, p["w"], p["b"], p["stride"],
                       LRELU_ALPHA if p["lrelu"] else None)
    return y


def multiscale_forward(all_params, x_nchw):
    """Matches MultiscaleDiscriminator.forward (getIntermFeat=False).

    Returns: list of length num_D; element i is a one-element list with the
    output of discriminator (num_D-1-i) applied to the i-times-downsampled input,
    in NCHW layout (N, 1, Ho, Wo), matching PyTorch.
    """
    x = jnp.transpose(x_nchw, (0, 2, 3, 1)).astype(jnp.float32)   # NCHW -> NHWC
    num_D = len(all_params)
    result = []
    xd = x
    for i in range(num_D):
        params = all_params[num_D - 1 - i]
        out = nlayer_forward(params, xd)
        result.append([jnp.transpose(out, (0, 3, 1, 2))])          # back to NCHW
        if i != num_D - 1:
            xd = avgpool3x3_s2(xd)
    return result


# ----------------------------------------------------------------------------
if __name__ == "__main__":
    # Small config consistent with the module: num_D=3, n_layers=3 (ndf shrunk).
    N, INPUT_NC, H, W = 2, 4, 16, 16
    NDF, N_LAYERS, NUM_D = 16, 3, 3

    key = jax.random.PRNGKey(0)
    all_params = []
    for _ in range(NUM_D):
        params, key = init_nlayer_params(key, INPUT_NC, NDF, N_LAYERS)
        all_params.append(params)

    key, kx = jax.random.split(key)
    x = jax.random.normal(kx, (N, INPUT_NC, H, W), jnp.float32)

    result = multiscale_forward(all_params, x)
    for scale_outs in result:
        for t in scale_outs:
            jax.block_until_ready(t)

    print("KERNEL_OK")
</pallas_src>

<mosaic_0001>
module attributes {stable_mosaic.version = 11 : i64} {
  func.func @_matmul_bias_act_kernel(%arg0: i32, %arg1: i32, %arg2: i32, %arg3: memref<168x128xbf16, #tpu.memory_space<vmem>>, %arg4: memref<128x128xbf16, #tpu.memory_space<vmem>>, %arg5: memref<1x128xf32, #tpu.memory_space<vmem>>, %arg6: memref<168x128xf32, #tpu.memory_space<vmem>>, %arg7: memref<168x128xf32, #tpu.memory_space<vmem>>) attributes {dimension_semantics = [#tpu.dimension_semantics<parallel>, #tpu.dimension_semantics<parallel>, #tpu.dimension_semantics<arbitrary>], iteration_bounds = array<i64: 1, 1, 1>, scalar_prefetch = 0 : i64, scratch_operands = 1 : i64, tpu.core_type = #tpu.core_type<tc>, window_params = [{transform_indices = @transform_0, window_bounds = array<i64: 168, 128>}, {transform_indices = @transform_1, window_bounds = array<i64: 128, 128>}, {transform_indices = @transform_2, window_bounds = array<i64: 1, 128>}, {transform_indices = @transform_3, window_bounds = array<i64: 168, 128>}]} {
    %c0_i32 = arith.constant 0 : i32
    %0 = arith.cmpi eq, %arg2, %c0_i32 : i32
    %1 = arith.extui %0 : i1 to i32
    %c0_i32_0 = arith.constant 0 : i32
    %2 = arith.cmpi ne, %1, %c0_i32_0 : i32
    scf.if %2 {
      %cst_10 = arith.constant 0.000000e+00 : f32
      %12 = vector.broadcast %cst_10 : f32 to vector<168x128xf32>
      %c0_11 = arith.constant 0 : index
      %c0_12 = arith.constant 0 : index
      %13 = vector.load %arg7[%c0_11, %c0_12] : memref<168x128xf32, #tpu.memory_space<vmem>>, vector<168x128xf32>
      tpu.vector_store %arg7[%c0_11, %c0_12], %12 {strides = array<i32>} : memref<168x128xf32, #tpu.memory_space<vmem>>, vector<168x128xf32>,
    } else {
    }
    %c0 = arith.constant 0 : index
    %c0_1 = arith.constant 0 : index
    %3 = vector.load %arg7[%c0, %c0_1] : memref<168x128xf32, #tpu.memory_space<vmem>>, vector<168x128xf32>
    %c0_2 = arith.constant 0 : index
    %c0_3 = arith.constant 0 : index
    %4 = vector.load %arg3[%c0_2, %c0_3] : memref<168x128xbf16, #tpu.memory_space<vmem>>, vector<168x128xbf16>
    %c0_4 = arith.constant 0 : index
    %c0_5 = arith.constant 0 : index
    %5 = vector.load %arg4[%c0_4, %c0_5] : memref<128x128xbf16, #tpu.memory_space<vmem>>, vector<128x128xbf16>
    %cst = arith.constant dense<0.000000e+00> : vector<168x128xf32>
    %6 = tpu.matmul %4, %5, %cst {dimension_numbers = #tpu.dot_dimension_numbers<[1], [0], [0], [1], [0, 0, 1, 1], [], []>} : vector<168x128xbf16>, vector<128x128xbf16>, vector<168x128xf32> -> vector<168x128xf32>
    %7 = arith.addf %3, %6 : vector<168x128xf32>
    %c0_6 = arith.constant 0 : index
    %c0_7 = arith.constant 0 : index
    %8 = vector.load %arg7[%c0_6, %c0_7] : memref<168x128xf32, #tpu.memory_space<vmem>>, vector<168x128xf32>
    tpu.vector_store %arg7[%c0_6, %c0_7], %7 {strides = array<i32>} : memref<168x128xf32, #tpu.memory_space<vmem>>, vector<168x128xf32>,
    %c0_i32_8 = arith.constant 0 : i32
    %9 = arith.cmpi eq, %arg2, %c0_i32_8 : i32
    %10 = arith.extui %9 : i1 to i32
    %c0_i32_9 = arith.constant 0 : i32
    %11 = arith.cmpi ne, %10, %c0_i32_9 : i32
    scf.if %11 {
      %c0_10 = arith.constant 0 : index
      %c0_11 = arith.constant 0 : index
      %12 = vector.load %arg7[%c0_10, %c0_11] : memref<168x128xf32, #tpu.memory_space<vmem>>, vector<168x128xf32>
      %c0_12 = arith.constant 0 : index
      %c0_13 = arith.constant 0 : index
      %13 = vector.load %arg5[%c0_12, %c0_13] : memref<1x128xf32, #tpu.memory_space<vmem>>, vector<1x128xf32>
      %14 = vector.broadcast %13 : vector<1x128xf32> to vector<168x128xf32>
      %15 = arith.addf %12, %14 : vector<168x128xf32>
      %cst_14 = arith.constant 0.000000e+00 : f32
      %16 = vector.broadcast %cst_14 : f32 to vector<168x128xf32>
      %17 = arith.cmpf oge, %15, %16 : vector<168x128xf32>
      %cst_15 = arith.constant 2.000000e-01 : f32
      %18 = vector.broadcast %cst_15 : f32 to vector<168x128xf32>
      %19 = arith.mulf %18, %15 : vector<168x128xf32>
      %20 = arith.select %17, %15, %19 : vector<168x128xi1>, vector<168x128xf32>
      %c0_16 = arith.constant 0 : index
      %c0_17 = arith.constant 0 : index
      %21 = vector.load %arg6[%c0_16, %c0_17] : memref<168x128xf32, #tpu.memory_space<vmem>>, vector<168x128xf32>
      tpu.vector_store %arg6[%c0_16, %c0_17], %20 {strides = array<i32>} : memref<168x128xf32, #tpu.memory_space<vmem>>, vector<168x128xf32>,
    } else {
    }
    return
  }
  func.func @transform_0(%arg0: i32, %arg1: i32, %arg2: i32) -> (i32, i32) {
    %c0_i32 = arith.constant 0 : i32
    return %arg0, %arg2 : i32, i32
  }
  func.func @transform_1(%arg0: i32, %arg1: i32, %arg2: i32) -> (i32, i32) {
    %c0_i32 = arith.constant 0 : i32
    return %arg2, %arg1 : i32, i32
  }
  func.func @transform_2(%arg0: i32, %arg1: i32, %arg2: i32) -> (i32, i32) {
    %c0_i32 = arith.constant 0 : i32
    %c0_i32_0 = arith.constant 0 : i32
    return %c0_i32, %arg1 : i32, i32
  }
  func.func @transform_3(%arg0: i32, %arg1: i32, %arg2: i32) -> (i32, i32) {
    %c0_i32 = arith.constant 0 : i32
    return %arg0, %arg1 : i32, i32
  }
}

</mosaic_0001>

<bundles_post_ra>
// kernel: tpu_custom_call.1
= control target key start
LH: loop header
LB: loop body
LE: loop exit
PB: predicated region body
PF: predicated region fallthrough
CT: control target
= control target key end

     0   :  { %8 = vsyncpa [#allocation4], 0  ;;  %s899_s0 = inlined_call_operand.hbm [shape: bf16[168,128], index: 0, kind: input, shape index: {}]   ;;  %s900_s1 = inlined_call_operand.hbm [shape: bf16[128,128], index: 1, kind: input, shape index: {}]   ;;  %s901_s2 = inlined_call_operand.vmem [shape: f32[1,128], index: 2, kind: input, shape index: {}]   ;;  %s902_s3 = inlined_call_operand.hbm [shape: f32[168,128], index: 3, kind: output, shape index: {}]  }
   0x1   :  { %9 = vsyncpa [#allocation7], 0 }
   0x2   :  { %10 = vsyncpa [#allocation5], 0  ;;  %s770_s12 = smov [#allocation3]   ;;  %s698_s16 = scalar_lea.hbm %s899_s0, 1344 }
   0x3   :  { %s16_s13 = sshll.u32 %s770_s12, 4  ;;  %p699_p0 = scmp.ne.s32.totalorder %s899_s0, %s698_s16  ;;  %s17_s13 = int_to_ptr.vmem [resolvable:$true] %s16_s13 }
   0x4   :  { %p702_p1 = scmp.lt.u32.totalorder %s698_s16, %s899_s0 }
   0x6   :  { %p704_p2 = pnand %p702_p1, %p699_p0 }
   0x8   :  { %707 = shalt.err (!%p704_p2)
}
   0x9   :  { %s708_s21 = scalar_lea.vmem %s17_s13, 1344  ;;  %p713_p4 = scmp.lt.s32.totalorder %s17_s13, %s17_s13 }
   0xa   :  { %p709_p3 = scmp.ne.s32.totalorder %s17_s13, %s708_s21  ;;  %p714_p5 = scmp.lt.s32.totalorder %s708_s21, %s708_s21 }
   0xc   :  { %p715_p6 = por %p714_p5, %p713_p4 }
   0xe   :  { %p716_p7 = pnand %p715_p6, %p709_p3 }
  0x10   :  { %719 = shalt.err (!%p716_p7)
}
  0x11   :  { %s771_s22 = smov 64   ;;  %s772_s23 = smov 4  }
  0x12   :  { %22 = dma.hbm_to_vmem [thread:$0]  %s899_s0, 1344, %s17_s13, [#allocation4], %s771_s22, %s771_s22, %s772_s23  }
  0x13   :  { %s773_s26 = smov [#allocation6]   ;;  %s720_s30 = scalar_lea.hbm %s900_s1, 1024 }
  0x14   :  { %s28_s27 = sshll.u32 %s773_s26, 4  ;;  %p721_p8 = scmp.ne.s32.totalorder %s900_s1, %s720_s30  ;;  %s29_s27 = int_to_ptr.vmem [resolvable:$true] %s28_s27 }
  0x15   :  { %p724_p9 = scmp.lt.u32.totalorder %s720_s30, %s900_s1 }
  0x17   :  { %p726_p10 = pnand %p724_p9, %p721_p8 }
  0x19   :  { %729 = shalt.err (!%p726_p10)
}
  0x1a   :  { %s730_s8 = scalar_lea.vmem %s29_s27, 1024  ;;  %p735_p12 = scmp.lt.s32.totalorder %s29_s27, %s29_s27 }
  0x1b   :  { %p731_p11 = scmp.ne.s32.totalorder %s29_s27, %s730_s8  ;;  %p736_p13 = scmp.lt.s32.totalorder %s730_s8, %s730_s8 }
  0x1d   :  { %p737_p0 = por %p736_p13, %p735_p12 }
  0x1f   :  { %p738_p1 = pnand %p737_p0, %p731_p11 }
  0x21   :  { %741 = shalt.err (!%p738_p1)
}
  0x22   :  { %34 = dma.hbm_to_vmem [thread:$0]  %s900_s1, 1024, %s29_s27, [#allocation7], %s771_s22, %s771_s22, %s772_s23  }
  0x23   :  { %764 = dma.done.wait [#allocation4], 1344  }
  0x24   :  { %765 = vsyncadd [#allocation4], 4294965952 }
  0x25   :  { %766 = dma.done.wait [#allocation7], 1024  }
  0x26   :  { %767 = vsyncadd [#allocation7], 4294966272  ;;  %v774_v0 = vmov 0.0   ;;  %vm775_vm0 = vmmov 0   ;;  %v679_v1 = vld [vmem:[#allocation6] sm:$0xff]   ;;  %v680_v2 = vld [vmem:[#allocation6 + $0x8] sm:$0xff]  }
  0x27   :  { %594 = vmatprep.subr.bf16.mxu0 %v774_v0  ;;  %654 = vmatprep.subr.bf16.mxu1 %v774_v0  ;;  %v681_v3 = vld [vmem:[#allocation6 + $0x10] sm:$0xff]   ;;  %v682_v4 = vld [vmem:[#allocation6 + $0x18] sm:$0xff]   ;;  %v683_v5 = vld [vmem:[#allocation6 + $0x20] sm:$0xff]  }
  0x28   :  { %610 = vmatprep.mubr.msk.bf16.mxu0 %vm775_vm0, %v774_v0  ;;  %634 = vmatprep.mubr.msk.bf16.mxu1 %vm775_vm0, %v774_v0  ;;  %v684_v6 = vld [vmem:[#allocation6 + $0x28] sm:$0xff]   ;;  %v685_v7 = vld [vmem:[#allocation6 + $0x30] sm:$0xff]   ;;  %v686_v8 = vld [vmem:[#allocation6 + $0x38] sm:$0xff]  }
  0x29   :  { %595 = vmatpush3.bf16.msra.mxu0 %v679_v1  ;;  %662 = vmatpush3.bf16.msra.mxu1 %v679_v1  ;;  %v687_v9 = vld [vmem:[#allocation3] sm:$0xff]   ;;  %v688_v10 = vld [vmem:[#allocation3 + $0x30] sm:$0xff]   ;;  %v689_v11 = vld [vmem:[#allocation3 + $0x8] sm:$0xff]  }
  0x2a   :  { %596 = vmatprep.subr.bf16.mxu0 %v774_v0  ;;  %655 = vmatprep.subr.bf16.mxu1 %v774_v0  ;;  %v690_v12 = vld [vmem:[#allocation3 + $0x38] sm:$0xff]   ;;  %v691_v13 = vld [vmem:[#allocation3 + $0x10] sm:$0xff]   ;;  %v692_v14 = vld [vmem:[#allocation3 + $0x40] sm:$0xff]  }
  0x2b   :  { %v693_v15 = vld [vmem:[#allocation3 + $0x18] sm:$0xff]   ;;  %v694_v16 = vld [vmem:[#allocation3 + $0x48] sm:$0xff]   ;;  %v695_v17 = vld [vmem:[#allocation3 + $0x20] sm:$0xff]  }
  0x2c   :  { %v696_v18 = vld [vmem:[#allocation3 + $0x50] ss:$0 sps:$4 sm:$0xff]   ;;  %v697_v19 = vld [vmem:[#allocation3 + $0x28] sm:$0xff]   ;;  %v864_v20 = vld [vmem:[%s901_s2] ss:$0 sm:$0xff]  ;;  %s776_s2 = smov [#allocation8]  }
  0x2d   :  { %597 = vmatpush3.bf16.msra.mxu0 %v680_v2  ;;  %663 = vmatpush3.bf16.msra.mxu1 %v680_v2  ;;  %s542_s11 = sshll.u32 %s776_s2, 4  ;;  %s543_s11 = int_to_ptr.vmem [resolvable:$true] %s542_s11 }
  0x2e   :  { %598 = vmatprep.subr.bf16.mxu0 %v774_v0  ;;  %656 = vmatprep.subr.bf16.mxu1 %v774_v0  ;;  %s742_s12 = scalar_lea.vmem %s543_s11, 2688  ;;  %p747_p3 = scmp.lt.s32.totalorder %s543_s11, %s543_s11 }
  0x2f   :  { %p743_p2 = scmp.ne.s32.totalorder %s543_s11, %s742_s12  ;;  %p748_p4 = scmp.lt.s32.totalorder %s742_s12, %s742_s12 }
  0x31   :  { %599 = vmatpush3.bf16.msra.mxu0 %v681_v3  ;;  %664 = vmatpush3.bf16.msra.mxu1 %v681_v3  ;;  %p749_p5 = por %p748_p4, %p747_p3 }
  0x32   :  { %600 = vmatprep.subr.bf16.mxu0 %v774_v0  ;;  %657 = vmatprep.subr.bf16.mxu1 %v774_v0 }
  0x33   :  { %p750_p6 = pnand %p749_p5, %p743_p2 }
  0x35   :  { %601 = vmatpush3.bf16.msra.mxu0 %v682_v4  ;;  %665 = vmatpush3.bf16.msra.mxu1 %v682_v4 }
  0x36   :  { %602 = vmatprep.subr.bf16.mxu0 %v774_v0  ;;  %658 = vmatprep.subr.bf16.mxu1 %v774_v0 }
  0x39   :  { %603 = vmatpush3.bf16.msra.mxu0 %v683_v5  ;;  %666 = vmatpush3.bf16.msra.mxu1 %v683_v5 }
  0x3a   :  { %604 = vmatprep.subr.bf16.mxu0 %v774_v0  ;;  %659 = vmatprep.subr.bf16.mxu1 %v774_v0 }
  0x3d   :  { %605 = vmatpush3.bf16.msra.mxu0 %v684_v6  ;;  %667 = vmatpush3.bf16.msra.mxu1 %v684_v6 }
  0x3e   :  { %606 = vmatprep.subr.bf16.mxu0 %v774_v0  ;;  %660 = vmatprep.subr.bf16.mxu1 %v774_v0 }
  0x41   :  { %607 = vmatpush3.bf16.msra.mxu0 %v685_v7  ;;  %668 = vmatpush3.bf16.msra.mxu1 %v685_v7 }
  0x42   :  { %608 = vmatprep.subr.bf16.mxu0 %v774_v0  ;;  %661 = vmatprep.subr.bf16.mxu1 %v774_v0 }
  0x45   :  { %609 = vmatpush3.bf16.msra.mxu0 %v686_v8  ;;  %669 = vmatpush3.bf16.msra.mxu1 %v686_v8 }
  0x48   :  { %611 = vmatmul.mubr.bf16.vlgmr.msra.gmra.mrb[0].mxu0 %v687_v9  ;;  %635 = vmatmul.mubr.bf16.vlgmr.msra.gmra.mrb[0].mxu1 %v688_v10 }
  0x49   :  { %614 = vmatprep.mubr.msk.bf16.mxu0 %vm775_vm0, %v774_v0  ;;  %638 = vmatprep.mubr.msk.bf16.mxu1 %vm775_vm0, %v774_v0 }
  0x50   :  { %615 = vmatmul.mubr.bf16.gmra.mrb[4].mxu0 %v689_v11  ;;  %639 = vmatmul.mubr.bf16.gmra.mrb[4].mxu1 %v690_v12 }
  0x51   :  { %618 = vmatprep.mubr.msk.bf16.mxu0 %vm775_vm0, %v774_v0  ;;  %642 = vmatprep.mubr.msk.bf16.mxu1 %vm775_vm0, %v774_v0 }
  0x58   :  { %619 = vmatmul.mubr.bf16.gmra.mrb[8].mxu0 %v691_v13  ;;  %643 = vmatmul.mubr.bf16.gmra.mrb[8].mxu1 %v692_v14 }
  0x59   :  { %622 = vmatprep.mubr.msk.bf16.mxu0 %vm775_vm0, %v774_v0  ;;  %646 = vmatprep.mubr.msk.bf16.mxu1 %vm775_vm0, %v774_v0 }
  0x60   :  { %623 = vmatmul.mubr.bf16.gmra.mrb[12].mxu0 %v693_v15  ;;  %647 = vmatmul.mubr.bf16.gmra.mrb[12].mxu1 %v694_v16 }
  0x61   :  { %626 = vmatprep.mubr.msk.bf16.mxu0 %vm775_vm0, %v774_v0  ;;  %650 = vmatprep.mubr.msk.bf16.mxu1 %vm775_vm0, %v774_v0 }
  0x68   :  { %627 = vmatmul.mubr.bf16.gmra.mrb[16].mxu0 %v695_v17  ;;  %651 = vmatmul.mubr.bf16.gmra.mrb[16].mxu1 %v696_v18 }
  0x69   :  { %630 = vmatprep.mubr.msk.bf16.mxu0 %vm775_vm0, %v774_v0 }
  0x70   :  { %631 = vmatmul.mubr.bf16.gmra.mrb[20].mxu0 %v697_v19 }
 0x11b   :  { %v273_v21 = vpop.f32.mrb[0].mxu0  ;;  %v321_v22 = vpop.f32.mrb[0].mxu1 }
 0x11c   :  { %v432_v23 = vadd.f32 %v864_v20, %v273_v21  ;;  %v612_v24 = vpop.f32.mrb[1].mxu0  ;;  %v444_v25 = vadd.f32 %v864_v20, %v321_v22  ;;  %v636_v26 = vpop.f32.mrb[1].mxu1 }
 0x11d   :  { %v276_v27 = vpop.f32.mrb[2].mxu0  ;;  %v324_v28 = vpop.f32.mrb[2].mxu1 }
 0x11e   :  { %vm453_vm1 = vcmp.ge.f32.partialorder %v432_v23, 0.0  ;;  %v474_v29 = vmul.f32 0.2, %v432_v23  ;;  %v433_v30 = vadd.f32 %v864_v20, %v276_v27  ;;  %v613_v31 = vpop.f32.mrb[3].mxu0  ;;  %vm465_vm2 = vcmp.ge.f32.partialorder %v444_v25, 0.0  ;;  %v637_v32 = vpop.f32.mrb[3].mxu1 }
 0x11f   :  { %v486_v33 = vmul.f32 0.2, %v444_v25  ;;  %v445_v34 = vadd.f32 %v864_v20, %v324_v28 }
 0x120   :  { %v495_v35 = vsel %vm453_vm1, %v432_v23, %v474_v29  ;;  %vm454_vm3 = vcmp.ge.f32.partialorder %v433_v30, 0.0  ;;  %v475_v36 = vmul.f32 0.2, %v433_v30 }
 0x121   :  { %516 = vst [vmem:[#allocation8] sm:$0xff] %v495_v35  ;;  %v507_v37 = vsel %vm465_vm2, %v444_v25, %v486_v33  ;;  %vm466_vm4 = vcmp.ge.f32.partialorder %v445_v34, 0.0  ;;  %v487_v38 = vmul.f32 0.2, %v445_v34 }
 0x122   :  { %v496_v39 = vsel %vm454_vm3, %v433_v30, %v475_v36  ;;  %528 = vst [vmem:[#allocation8 + $0x60] sm:$0xff] %v507_v37 }
 0x123   :  { %517 = vst [vmem:[#allocation8 + $0x8] sm:$0xff] %v496_v39  ;;  %v281_v40 = vpop.f32.mrb[4].mxu0  ;;  %v508_v41 = vsel %vm466_vm4, %v445_v34, %v487_v38  ;;  %v329_v42 = vpop.f32.mrb[4].mxu1 }
 0x124   :  { %v434_v43 = vadd.f32 %v864_v20, %v281_v40  ;;  %529 = vst [vmem:[#allocation8 + $0x68] sm:$0xff] %v508_v41  ;;  %v616_v44 = vpop.f32.mrb[5].mxu0  ;;  %v446_v45 = vadd.f32 %v864_v20, %v329_v42  ;;  %v640_v46 = vpop.f32.mrb[5].mxu1 }
 0x125   :  { %v284_v47 = vpop.f32.mrb[6].mxu0  ;;  %v332_v48 = vpop.f32.mrb[6].mxu1 }
 0x126   :  { %vm455_vm5 = vcmp.ge.f32.partialorder %v434_v43, 0.0  ;;  %v476_v49 = vmul.f32 0.2, %v434_v43  ;;  %v435_v50 = vadd.f32 %v864_v20, %v284_v47  ;;  %v617_v51 = vpop.f32.mrb[7].mxu0  ;;  %vm467_vm6 = vcmp.ge.f32.partialorder %v446_v45, 0.0  ;;  %v641_v52 = vpop.f32.mrb[7].mxu1 }
 0x127   :  { %v488_v53 = vmul.f32 0.2, %v446_v45  ;;  %v447_v54 = vadd.f32 %v864_v20, %v332_v48 }
 0x128   :  { %v497_v55 = vsel %vm455_vm5, %v434_v43, %v476_v49  ;;  %vm456_vm7 = vcmp.ge.f32.partialorder %v435_v50, 0.0  ;;  %v477_v56 = vmul.f32 0.2, %v435_v50 }
 0x129   :  { %518 = vst [vmem:[#allocation8 + $0x10] sm:$0xff] %v497_v55  ;;  %v509_v57 = vsel %vm467_vm6, %v446_v45, %v488_v53  ;;  %vm468_vm8 = vcmp.ge.f32.partialorder %v447_v54, 0.0  ;;  %v489_v58 = vmul.f32 0.2, %v447_v54 }
 0x12a   :  { %v498_v59 = vsel %vm456_vm7, %v435_v50, %v477_v56  ;;  %530 = vst [vmem:[#allocation8 + $0x70] sm:$0xff] %v509_v57 }
 0x12b   :  { %519 = vst [vmem:[#allocation8 + $0x18] sm:$0xff] %v498_v59  ;;  %v289_v60 = vpop.f32.mrb[8].mxu0  ;;  %v510_v61 = vsel %vm468_vm8, %v447_v54, %v489_v58  ;;  %v337_v62 = vpop.f32.mrb[8].mxu1 }
 0x12c   :  { %v436_v63 = vadd.f32 %v864_v20, %v289_v60  ;;  %531 = vst [vmem:[#allocation8 + $0x78] sm:$0xff] %v510_v61  ;;  %v620_v0 = vpop.f32.mrb[9].mxu0  ;;  %v448_v1 = vadd.f32 %v864_v20, %v337_v62  ;;  %v644_v2 = vpop.f32.mrb[9].mxu1 }
 0x12d   :  { %v292_v3 = vpop.f32.mrb[10].mxu0  ;;  %v340_v4 = vpop.f32.mrb[10].mxu1 }
 0x12e   :  { %vm457_vm9 = vcmp.ge.f32.partialorder %v436_v63, 0.0  ;;  %v478_v5 = vmul.f32 0.2, %v436_v63  ;;  %v437_v6 = vadd.f32 %v864_v20, %v292_v3  ;;  %v621_v7 = vpop.f32.mrb[11].mxu0  ;;  %vm469_vm10 = vcmp.ge.f32.partialorder %v448_v1, 0.0  ;;  %v645_v8 = vpop.f32.mrb[11].mxu1 }
 0x12f   :  { %v490_v9 = vmul.f32 0.2, %v448_v1  ;;  %v449_v10 = vadd.f32 %v864_v20, %v340_v4 }
 0x130   :  { %v499_v11 = vsel %vm457_vm9, %v436_v63, %v478_v5  ;;  %vm458_vm11 = vcmp.ge.f32.partialorder %v437_v6, 0.0  ;;  %v479_v12 = vmul.f32 0.2, %v437_v6 }
 0x131   :  { %520 = vst [vmem:[#allocation8 + $0x20] sm:$0xff] %v499_v11  ;;  %v511_v13 = vsel %vm469_vm10, %v448_v1, %v490_v9  ;;  %vm470_vm12 = vcmp.ge.f32.partialorder %v449_v10, 0.0  ;;  %v491_v14 = vmul.f32 0.2, %v449_v10 }
 0x132   :  { %v500_v15 = vsel %vm458_vm11, %v437_v6, %v479_v12  ;;  %532 = vst [vmem:[#allocation8 + $0x80] sm:$0xff] %v511_v13 }
 0x133   :  { %521 = vst [vmem:[#allocation8 + $0x28] sm:$0xff] %v500_v15  ;;  %v297_v16 = vpop.f32.mrb[12].mxu0  ;;  %v512_v17 = vsel %vm470_vm12, %v449_v10, %v491_v14  ;;  %v345_v18 = vpop.f32.mrb[12].mxu1 }
 0x134   :  { %v438_v19 = vadd.f32 %v864_v20, %v297_v16  ;;  %533 = vst [vmem:[#allocation8 + $0x88] sm:$0xff] %v512_v17  ;;  %v624_v21 = vpop.f32.mrb[13].mxu0  ;;  %v450_v22 = vadd.f32 %v864_v20, %v345_v18  ;;  %v648_v23 = vpop.f32.mrb[13].mxu1 }
 0x135   :  { %v300_v24 = vpop.f32.mrb[14].mxu0  ;;  %v348_v25 = vpop.f32.mrb[14].mxu1 }
 0x136   :  { %vm459_vm13 = vcmp.ge.f32.partialorder %v438_v19, 0.0  ;;  %v480_v26 = vmul.f32 0.2, %v438_v19  ;;  %v439_v27 = vadd.f32 %v864_v20, %v300_v24  ;;  %v625_v28 = vpop.f32.mrb[15].mxu0  ;;  %vm471_vm14 = vcmp.ge.f32.partialorder %v450_v22, 0.0  ;;  %v649_v29 = vpop.f32.mrb[15].mxu1 }
 0x137   :  { %v492_v30 = vmul.f32 0.2, %v450_v22  ;;  %v451_v31 = vadd.f32 %v864_v20, %v348_v25 }
 0x138   :  { %v501_v32 = vsel %vm459_vm13, %v438_v19, %v480_v26  ;;  %vm460_vm15 = vcmp.ge.f32.partialorder %v439_v27, 0.0  ;;  %v481_v33 = vmul.f32 0.2, %v439_v27 }
 0x139   :  { %522 = vst [vmem:[#allocation8 + $0x30] sm:$0xff] %v501_v32  ;;  %v513_v34 = vsel %vm471_vm14, %v450_v22, %v492_v30  ;;  %vm472_vm0 = vcmp.ge.f32.partialorder %v451_v31, 0.0  ;;  %v493_v35 = vmul.f32 0.2, %v451_v31 }
 0x13a   :  { %v502_v36 = vsel %vm460_vm15, %v439_v27, %v481_v33  ;;  %534 = vst [vmem:[#allocation8 + $0x90] sm:$0xff] %v513_v34 }
 0x13b   :  { %523 = vst [vmem:[#allocation8 + $0x38] sm:$0xff] %v502_v36  ;;  %v305_v37 = vpop.f32.mrb[16].mxu0  ;;  %v514_v38 = vsel %vm472_vm0, %v451_v31, %v493_v35  ;;  %v353_v39 = vpop.f32.mrb[16].mxu1 }
 0x13c   :  { %v440_v40 = vadd.f32 %v864_v20, %v305_v37  ;;  %535 = vst [vmem:[#allocation8 + $0x98] sm:$0xff] %v514_v38  ;;  %v628_v41 = vpop.f32.mrb[17].mxu0  ;;  %v452_v42 = vadd.f32 %v864_v20, %v353_v39  ;;  %v652_v43 = vpop.f32.mrb[17].mxu1 }
 0x13d   :  { %v308_v44 = vpop.f32.mrb[18].mxu0  ;;  %v356_v45 = vpop.f32.mrb[18].mxu1 }
 0x13e   :  { %vm461_vm1 = vcmp.ge.f32.partialorder %v440_v40, 0.0  ;;  %v482_v46 = vmul.f32 0.2, %v440_v40  ;;  %v441_v47 = vadd.f32 %v864_v20, %v308_v44  ;;  %v629_v48 = vpop.f32.mrb[19].mxu0  ;;  %vm473_vm2 = vcmp.ge.f32.partialorder %v452_v42, 0.0  ;;  %v653_v49 = vpop.f32.mrb[19].mxu1 }
 0x13f   :  { %v494_v50 = vmul.f32 0.2, %v452_v42 }
 0x140   :  { %v503_v51 = vsel %vm461_vm1, %v440_v40, %v482_v46  ;;  %vm462_vm3 = vcmp.ge.f32.partialorder %v441_v47, 0.0  ;;  %v483_v52 = vmul.f32 0.2, %v441_v47 }
 0x141   :  { %524 = vst [vmem:[#allocation8 + $0x40] sm:$0xff] %v503_v51  ;;  %v515_v53 = vsel %vm473_vm2, %v452_v42, %v494_v50 }
 0x142   :  { %v504_v54 = vsel %vm462_vm3, %v441_v47, %v483_v52  ;;  %536 = vst [vmem:[#allocation8 + $0xa0] sm:$0xff] %v515_v53 }
 0x143   :  { %525 = vst [vmem:[#allocation8 + $0x48] sm:$0xff] %v504_v54  ;;  %v313_v55 = vpop.f32.mrb[20].mxu0 }
 0x144   :  { %v442_v56 = vadd.f32 %v864_v20, %v313_v55  ;;  %v632_v57 = vpop.f32.mrb[21].mxu0 }
 0x145   :  { %v316_v58 = vpop.f32.mrb[22].mxu0 }
 0x146   :  { %vm463_vm4 = vcmp.ge.f32.partialorder %v442_v56, 0.0  ;;  %v484_v59 = vmul.f32 0.2, %v442_v56  ;;  %v443_v60 = vadd.f32 %v864_v20, %v316_v58  ;;  %v633_v61 = vpop.f32.mrb[23].mxu0 }
 0x148   :  { %v505_v62 = vsel %vm463_vm4, %v442_v56, %v484_v59  ;;  %vm464_vm5 = vcmp.ge.f32.partialorder %v443_v60, 0.0  ;;  %v485_v63 = vmul.f32 0.2, %v443_v60 }
 0x149   :  { %526 = vst [vmem:[#allocation8 + $0x50] sm:$0xff] %v505_v62 }
 0x14a   :  { %v506_v0 = vsel %vm464_vm5, %v443_v60, %v485_v63 }
 0x14b   :  { %527 = vst [vmem:[#allocation8 + $0x58] sm:$0xff] %v506_v0 }
 0x14c   :  { %753 = shalt.err (!%p750_p6)
}
 0x14d   :  { %s754_s15 = scalar_lea.hbm %s902_s3, 2688 }
 0x14e   :  { %p755_p7 = scmp.ne.s32.totalorder %s902_s3, %s754_s15  ;;  %p758_p8 = scmp.lt.u32.totalorder %s754_s15, %s902_s3 }
 0x150   :  { %p760_p9 = pnand %p758_p8, %p755_p7 }
 0x152   :  { %763 = shalt.err (!%p760_p9)
}
 0x153   :  { %s777_s20 = smov 128   ;;  %s778_s21 = smov 8  }
 0x154   :  { %548 = dma.vmem_to_hbm [thread:$0]  %s543_s11, 2688, %s902_s3, [#allocation5], %s777_s20, %s777_s20, %s778_s21  }
 0x155   :  { %768 = dma.done.wait [#allocation5], 2688  }
 0x156   :  { %769 = vsyncadd [#allocation5], 4294964608 }
 0x157   :  { %552 = vsyncpa [#allocation4], 1 }
 0x158   :  { %553 = vsyncpa [#allocation7], 1 }
 0x159   :  { %554 = vsyncpa [#allocation5], 1 }

</bundles_post_ra>
